<compile_context>
chip_gen: v5e
topology: v5e:2x2
jax: 0.10.0
libtpu: 0.0.40
codegen_flags: <defaults>
</compile_context>

<pallas_src>
from functools import partial

import jax
import jax.numpy as jnp
import numpy as np
from jax.experimental import pallas as pl
from jax.experimental.pallas import tpu as pltpu


def _round_up(x, m):
    return (x + m - 1) // m * m


def _vmem_capacity_bytes():
    try:
        info = pltpu.get_tpu_info()
        cap = getattr(info, "vmem_capacity_bytes", None)
        if cap:
            return int(cap)
    except Exception:
        pass
    return 64 * 1024 * 1024  # conservative fallback (v7x-sized)


def _sublane(dtype):
    # packed sublane granularity: f32 -> 8, bf16 -> 16, 8-bit -> 32
    return {4: 8, 2: 16, 1: 32}.get(jnp.dtype(dtype).itemsize, 8)


def _row_parallel_linear_kernel(x_ref, w_ref, b_ref, o_ref, acc_ref, *, tk, x_is_strip):
    # x_ref  : [tm, K_pad] (strip) or [tm, tk]   activation tile (compute dtype, e.g. bf16)
    # w_ref  : [tk, tn]    weight tile, transposed to [K, N] once at init
    # b_ref  : [1, tn]     bias tile, already scaled by 1/world_size, f32
    # o_ref  : [tm, tn]    output tile
    # acc_ref: [tm, tn]    f32 accumulator, persists across the K grid axis
    k = pl.program_id(2)

    @pl.when(k == 0)
    def _():
        acc_ref[...] = jnp.zeros_like(acc_ref)

    if x_is_strip:
        # K-strip is VMEM resident; slice the current K chunk (tk is a multiple of 128).
        start = pl.multiple_of(k * tk, tk)
        x_blk = x_ref[:, pl.ds(start, tk)]
    else:
        x_blk = x_ref[...]

    # bf16 x bf16 -> f32 accumulation on the MXU.
    acc_ref[...] += jnp.dot(x_blk, w_ref[...], preferred_element_type=jnp.float32)

    @pl.when(k == pl.num_programs(2) - 1)
    def _():
        o_ref[...] = (acc_ref[...] + b_ref[...]).astype(o_ref.dtype)


class RowParallelLinear:
    """JAX/Pallas equivalent of the PyTorch RowParallelLinear forward pass.

    weight_shard : [N, K_shard]  (PyTorch layout: linear.weight.chunk(ws, dim=1)[rank])
    bias         : [N] or None   (full bias; divided by world_size, as in the reference)
    """

    def __init__(self, weight_shard, bias, world_size, *,
                 compute_dtype=jnp.bfloat16, tm=512, tn=1024, tk=512):
        N, K = weight_shard.shape
        self.N, self.K = int(N), int(K)
        self.world_size = int(world_size)
        self.compute_dtype = jnp.dtype(compute_dtype)
        self.tm = int(tm)

        # ---- one-time tile choices that only depend on the (static) weight ----
        self.tn_eff = _round_up(min(int(tn), _round_up(self.N, 128)), 128)
        self.tk_eff = self.K if self.K <= int(tk) else _round_up(int(tk), 128)
        self.N_pad = _round_up(self.N, self.tn_eff)
        self.K_pad = _round_up(self.K, self.tk_eff)

        # ---- one-time weight/bias prep (amortized over all forward calls) ----
        w_t = jnp.asarray(weight_shard).T.astype(self.compute_dtype)      # [K, N]
        if (self.K_pad, self.N_pad) != (self.K, self.N):
            w_t = jnp.pad(w_t, ((0, self.K_pad - self.K), (0, self.N_pad - self.N)))
        self.weight_kn = w_t                                               # [K_pad, N_pad]

        if bias is None:
            b = jnp.zeros((self.N,), jnp.float32)
        else:
            b = jnp.asarray(bias).astype(jnp.float32) / self.world_size
        b = b.reshape(1, self.N)
        if self.N_pad != self.N:
            b = jnp.pad(b, ((0, 0), (0, self.N_pad - self.N)))
        self.bias_scaled = b                                               # [1, N_pad] f32

        # TODO(synk): optional fp8 (v7x) / int8 (v5e/v6e) weight path to halve weight HBM
        # traffic again in the bandwidth-bound decode regime.

    def __call__(self, x):
        lead = x.shape[:-1]
        assert x.shape[-1] == self.K, "x last dim must equal the weight shard's K"
        M = int(np.prod(lead)) if lead else 1
        out_dtype = x.dtype

        x_isz = self.compute_dtype.itemsize
        w_isz = self.compute_dtype.itemsize
        out_isz = jnp.dtype(out_dtype).itemsize
        sub = _sublane(self.compute_dtype)

        # ---- generation-aware VMEM budget (~96 MiB on 128 MiB parts, ~48 MiB on v7x) ----
        budget = (_vmem_capacity_bytes() * 3) // 4

        # ---- M tile (aligned to the packed sublane size of the compute dtype) ----
        tm_eff = _round_up(max(sub, min(self.tm, _round_up(M, sub))), sub)

        # ---- v7x: ensure >= 2 parallel (M,N) tiles so both TensorCores get work ----
        tn_eff = self.tn_eff
        if pl.cdiv(M, tm_eff) * (self.N_pad // tn_eff) < 2:
            q = self.N_pad // 128
            for d in range(q // 2, 0, -1):           # largest proper divisor of q
                if q % d == 0:
                    tn_eff = 128 * d
                    break

        # ---- keep the activation K-strip VMEM resident when it fits ----
        n_k = self.K_pad // self.tk_eff
        x_is_strip = (n_k > 1) and (
            2 * tm_eff * self.K_pad * x_isz <= min(16 << 20, budget // 4))

        def footprint(tm_e, strip):
            x_cols = self.K_pad if strip else self.tk_eff
            return (2 * tm_e * x_cols * x_isz            # x (double-buffered)
                    + 2 * self.tk_eff * tn_eff * w_isz   # weight
                    + 2 * tn_eff * 4                     # bias
                    + 2 * tm_e * tn_eff * out_isz        # output
                    + tm_e * tn_eff * 4)                 # f32 accumulator

        while footprint(tm_eff, x_is_strip) > budget and tm_eff > sub:
            tm_eff = _round_up(max(sub, tm_eff // 2), sub)
        if footprint(tm_eff, x_is_strip) > budget:
            x_is_strip = False

        M_pad = _round_up(M, tm_eff)
        grid = (M_pad // tm_eff, self.N_pad // tn_eff, n_k)

        # ---- per-call activation prep: reshape + cast + zero-pad (fused into one pass) ----
        x2 = x.reshape(M, self.K).astype(self.compute_dtype)
        if (M_pad, self.K_pad) != (M, self.K):
            x2 = jnp.pad(x2, ((0, M_pad - M), (0, self.K_pad - self.K)))

        if x_is_strip:
            x_spec = pl.BlockSpec((tm_eff, self.K_pad), lambda i, j, k: (i, 0))
        else:
            x_spec = pl.BlockSpec((tm_eff, self.tk_eff), lambda i, j, k: (i, k))
        w_spec = pl.BlockSpec((self.tk_eff, tn_eff), lambda i, j, k: (k, j))
        b_spec = pl.BlockSpec((1, tn_eff), lambda i, j, k: (0, j))
        o_spec = pl.BlockSpec((tm_eff, tn_eff), lambda i, j, k: (i, j))

        vmem_limit = int(min(budget,
                             max(footprint(tm_eff, x_is_strip) + (8 << 20), 32 << 20)))

        cost = pl.CostEstimate(
            flops=2 * M_pad * self.K_pad * self.N_pad,
            transcendentals=0,
            bytes_accessed=int(
                M_pad * self.K_pad * x_isz * (1 if x_is_strip else grid[1])  # x per N tile
                + self.K_pad * self.N_pad * w_isz * grid[0]                  # weight per M tile
                + self.N_pad * 4 * grid[0]
                + M_pad * self.N_pad * out_isz),
        )

        out = pl.pallas_call(
            partial(_row_parallel_linear_kernel, tk=self.tk_eff, x_is_strip=x_is_strip),
            out_shape=jax.ShapeDtypeStruct((M_pad, self.N_pad), out_dtype),
            grid_spec=pltpu.PrefetchScalarGridSpec(
                num_scalar_prefetch=0,
                grid=grid,
                in_specs=[x_spec, w_spec, b_spec],
                out_specs=o_spec,
                scratch_shapes=[pltpu.VMEM((tm_eff, tn_eff), jnp.float32)],
            ),
            compiler_params=pltpu.CompilerParams(
                dimension_semantics=("parallel", "parallel", "arbitrary"),
                vmem_limit_bytes=vmem_limit,
            ),
            cost_estimate=cost,
        )(x2, self.weight_kn, self.bias_scaled)

        out = out[:M, :self.N]
        return out.reshape(*lead, self.N)


def _check(batch, seq, in_features, out_features, world_size, rank, key, **kw):
    k_shard = in_features // world_size
    k_x, k_w, k_b = jax.random.split(key, 3)

    full_weight = jax.random.normal(k_w, (out_features, in_features), jnp.float32) * 0.02
    bias = jax.random.normal(k_b, (out_features,), jnp.float32) * 0.02
    weight_shard = full_weight[:, rank * k_shard:(rank + 1) * k_shard]   # [N, K/ws]
    x = jax.random.normal(k_x, (batch, seq, k_shard), jnp.float32)

    layer = RowParallelLinear(weight_shard, bias, world_size, **kw)
    out = jax.block_until_ready(layer(x))
    assert out.shape == (batch, seq, out_features)
    assert out.dtype == x.dtype

    # Reference of F.linear(x, w_shard, bias / world_size) with the same bf16 input
    # rounding the kernel applies (both accumulate in f32).
    cd = kw.get("compute_dtype", jnp.bfloat16)
    xe = x.astype(cd).astype(jnp.float32)
    we = weight_shard.astype(cd).astype(jnp.float32)
    ref = xe @ we.T + bias / world_size
    np.testing.assert_allclose(np.asarray(out), np.asarray(ref), rtol=2e-3, atol=2e-3)


if __name__ == "__main__":
    world_size = 4
    rank = 0
    key = jax.random.PRNGKey(0)
    k0, k1, k2 = jax.random.split(key, 3)

    # Base case (original demo shapes): M=16, K_shard=64, N=128.
    _check(batch=2, seq=8, in_features=256, out_features=128,
           world_size=world_size, rank=rank, key=k0)

    # Ragged M and N (exercises M padding and one-time N zero-padding of the weight).
    _check(batch=3, seq=5, in_features=256, out_features=100,
           world_size=world_size, rank=rank, key=k1)

    # Multi-step K reduction with the VMEM-resident activation K-strip (K_shard=256, tk=128).
    _check(batch=2, seq=8, in_features=1024, out_features=128,
           world_size=world_size, rank=rank, key=k2, tk=128)

    print("KERNEL_OK")
</pallas_src>

<mosaic_0001>
module attributes {stable_mosaic.version = 11 : i64} {
  func.func @_row_parallel_linear_kernel(%arg0: i32, %arg1: i32, %arg2: i32, %arg3: memref<16x64xbf16, #tpu.memory_space<vmem>>, %arg4: memref<64x128xbf16, #tpu.memory_space<vmem>>, %arg5: memref<1x128xf32, #tpu.memory_space<vmem>>, %arg6: memref<16x128xf32, #tpu.memory_space<vmem>>, %arg7: memref<16x128xf32, #tpu.memory_space<vmem>>) attributes {dimension_semantics = [#tpu.dimension_semantics<parallel>, #tpu.dimension_semantics<parallel>, #tpu.dimension_semantics<arbitrary>], iteration_bounds = array<i64: 1, 1, 1>, scalar_prefetch = 0 : i64, scratch_operands = 1 : i64, tpu.core_type = #tpu.core_type<tc>, window_params = [{transform_indices = @transform_0, window_bounds = array<i64: 16, 64>}, {transform_indices = @transform_1, window_bounds = array<i64: 64, 128>}, {transform_indices = @transform_2, window_bounds = array<i64: 1, 128>}, {transform_indices = @transform_3, window_bounds = array<i64: 16, 128>}]} {
    %c0_i32 = arith.constant 0 : i32
    %0 = arith.cmpi eq, %arg2, %c0_i32 : i32
    %1 = arith.extui %0 : i1 to i32
    %c0_i32_0 = arith.constant 0 : i32
    %2 = arith.cmpi ne, %1, %c0_i32_0 : i32
    scf.if %2 {
      %cst_10 = arith.constant 0.000000e+00 : f32
      %12 = vector.broadcast %cst_10 : f32 to vector<16x128xf32>
      %c0_11 = arith.constant 0 : index
      %c0_12 = arith.constant 0 : index
      %13 = vector.load %arg7[%c0_11, %c0_12] : memref<16x128xf32, #tpu.memory_space<vmem>>, vector<16x128xf32>
      tpu.vector_store %arg7[%c0_11, %c0_12], %12 {strides = array<i32>} : memref<16x128xf32, #tpu.memory_space<vmem>>, vector<16x128xf32>,
    } else {
    }
    %c0 = arith.constant 0 : index
    %c0_1 = arith.constant 0 : index
    %3 = vector.load %arg3[%c0, %c0_1] : memref<16x64xbf16, #tpu.memory_space<vmem>>, vector<16x64xbf16>
    %c0_2 = arith.constant 0 : index
    %c0_3 = arith.constant 0 : index
    %4 = vector.load %arg7[%c0_2, %c0_3] : memref<16x128xf32, #tpu.memory_space<vmem>>, vector<16x128xf32>
    %c0_4 = arith.constant 0 : index
    %c0_5 = arith.constant 0 : index
    %5 = vector.load %arg4[%c0_4, %c0_5] : memref<64x128xbf16, #tpu.memory_space<vmem>>, vector<64x128xbf16>
    %cst = arith.constant dense<0.000000e+00> : vector<16x128xf32>
    %6 = tpu.matmul %3, %5, %cst {dimension_numbers = #tpu.dot_dimension_numbers<[1], [0], [0], [1], [0, 0, 1, 1], [], []>} : vector<16x64xbf16>, vector<64x128xbf16>, vector<16x128xf32> -> vector<16x128xf32>
    %7 = arith.addf %4, %6 : vector<16x128xf32>
    %c0_6 = arith.constant 0 : index
    %c0_7 = arith.constant 0 : index
    %8 = vector.load %arg7[%c0_6, %c0_7] : memref<16x128xf32, #tpu.memory_space<vmem>>, vector<16x128xf32>
    tpu.vector_store %arg7[%c0_6, %c0_7], %7 {strides = array<i32>} : memref<16x128xf32, #tpu.memory_space<vmem>>, vector<16x128xf32>,
    %c0_i32_8 = arith.constant 0 : i32
    %9 = arith.cmpi eq, %arg2, %c0_i32_8 : i32
    %10 = arith.extui %9 : i1 to i32
    %c0_i32_9 = arith.constant 0 : i32
    %11 = arith.cmpi ne, %10, %c0_i32_9 : i32
    scf.if %11 {
      %c0_10 = arith.constant 0 : index
      %c0_11 = arith.constant 0 : index
      %12 = vector.load %arg7[%c0_10, %c0_11] : memref<16x128xf32, #tpu.memory_space<vmem>>, vector<16x128xf32>
      %c0_12 = arith.constant 0 : index
      %c0_13 = arith.constant 0 : index
      %13 = vector.load %arg5[%c0_12, %c0_13] : memref<1x128xf32, #tpu.memory_space<vmem>>, vector<1x128xf32>
      %14 = vector.broadcast %13 : vector<1x128xf32> to vector<16x128xf32>
      %15 = arith.addf %12, %14 : vector<16x128xf32>
      %c0_14 = arith.constant 0 : index
      %c0_15 = arith.constant 0 : index
      %16 = vector.load %arg6[%c0_14, %c0_15] : memref<16x128xf32, #tpu.memory_space<vmem>>, vector<16x128xf32>
      tpu.vector_store %arg6[%c0_14, %c0_15], %15 {strides = array<i32>} : memref<16x128xf32, #tpu.memory_space<vmem>>, vector<16x128xf32>,
    } else {
    }
    return
  }
  func.func @transform_0(%arg0: i32, %arg1: i32, %arg2: i32) -> (i32, i32) {
    %c0_i32 = arith.constant 0 : i32
    return %arg0, %arg2 : i32, i32
  }
  func.func @transform_1(%arg0: i32, %arg1: i32, %arg2: i32) -> (i32, i32) {
    %c0_i32 = arith.constant 0 : i32
    return %arg2, %arg1 : i32, i32
  }
  func.func @transform_2(%arg0: i32, %arg1: i32, %arg2: i32) -> (i32, i32) {
    %c0_i32 = arith.constant 0 : i32
    %c0_i32_0 = arith.constant 0 : i32
    return %c0_i32, %arg1 : i32, i32
  }
  func.func @transform_3(%arg0: i32, %arg1: i32, %arg2: i32) -> (i32, i32) {
    %c0_i32 = arith.constant 0 : i32
    return %arg0, %arg1 : i32, i32
  }
}

</mosaic_0001>

<bundles_post_ra>
// kernel: tpu_custom_call.1
= control target key start
LH: loop header
LB: loop body
LE: loop exit
PB: predicated region body
PF: predicated region fallthrough
CT: control target
= control target key end

     0   :  { %8 = vsyncpa [#allocation4], 0  ;;  %s301_s0 = inlined_call_operand.hbm [shape: bf16[16,64], index: 0, kind: input, shape index: {}]   ;;  %s302_s1 = inlined_call_operand.hbm [shape: bf16[64,128], index: 1, kind: input, shape index: {}]   ;;  %s303_s2 = inlined_call_operand.vmem [shape: f32[1,128], index: 2, kind: input, shape index: {}]   ;;  %s304_s3 = inlined_call_operand.hbm [shape: f32[16,128], index: 3, kind: output, shape index: {}]  }
   0x1   :  { %9 = vsyncpa [#allocation7], 0 }
   0x2   :  { %10 = vsyncpa [#allocation5], 0  ;;  %s15_s14 = sshll.u32 %s301_s0, 4  ;;  %s262_s15 = smov [#allocation3]   ;;  %s16_s14 = int_to_ptr.hbm [resolvable:$true] %s15_s14 }
   0x3   :  { %s17_s16 = sshll.u32 %s262_s15, 4  ;;  %s28_s19 = sshll.u32 %s302_s1, 4  ;;  %s18_s16 = int_to_ptr.vmem [resolvable:$true] %s17_s16  ;;  %s29_s19 = int_to_ptr.hbm [resolvable:$true] %s28_s19 }
   0x4   :  { %s263_s20 = smov 64   ;;  %s264_s21 = smov 4  }
   0x5   :  { %23 = dma.hbm_to_vmem [thread:$0]  %s16_s14, 128, %s18_s16, [#allocation4], %s263_s20, %s263_s20, %s264_s21  }
   0x6   :  { %s265_s22 = smov [#allocation6]  }
   0x7   :  { %s30_s23 = sshll.u32 %s265_s22, 4  ;;  %s31_s23 = int_to_ptr.vmem [resolvable:$true] %s30_s23 }
   0x8   :  { %36 = dma.hbm_to_vmem [thread:$0]  %s29_s19, 512, %s31_s23, [#allocation7], %s263_s20, %s263_s20, %s264_s21  }
   0x9   :  { %256 = dma.done.wait [#allocation4], 128  }
   0xa   :  { %257 = vsyncadd [#allocation4], 4294967168 }
   0xb   :  { %258 = dma.done.wait [#allocation7], 512  }
   0xc   :  { %259 = vsyncadd [#allocation7], 4294966784  ;;  %v175_v0 = vld [vmem:[#allocation6 + $0x18] sm:$0xff]  ;;  %v174_v1 = vld [vmem:[#allocation6 + $0x10] sm:$0xff]  ;;  %vm95_vm0 = vcmask 523264   ;;  %s266_s24 = smov [#allocation8]  }
   0xd   :  { %103 = vmatpush.bf16.msra.mxu0 %v175_v0  ;;  %v173_v2 = vld [vmem:[#allocation6 + $0x8] sm:$0xff]  ;;  %v172_v3 = vld [vmem:[#allocation6] sm:$0xff]  ;;  %v171_v4 = vld [vmem:[#allocation3] sm:$0xff]  ;;  %s134_s25 = sshll.u32 %s266_s24, 4  ;;  %s136_s28 = sshll.u32 %s304_s3, 4  ;;  %s135_s25 = int_to_ptr.vmem [resolvable:$true] %s134_s25  ;;  %s137_s28 = int_to_ptr.hbm [resolvable:$true] %s136_s28 }
   0xe   :  { %v183_v5 = vld [vmem:[%s303_s2] ss:$0 sm:$0xff]  ;;  %s267_s29 = smov 128   ;;  %s268_s30 = smov 8  }
  0x11   :  { %104 = vmatpush.bf16.msra.mxu0 %v174_v1 }
  0x15   :  { %105 = vmatpush.bf16.msra.mxu0 %v173_v2 }
  0x19   :  { %106 = vmatpush.bf16.msra.mxu0 %v172_v3 }
  0x1c   :  { %170 = vmatmul.msk.bf16.vlgmr.msra.gmra.mxu0 %vm95_vm0, %v171_v4 }
  0x99   :  { %v108_v6 = vpop.f32.mrf.mxu0 }
  0x9a   :  { %v126_v7 = vadd.f32 %v183_v5, %v108_v6 }
  0x9c   :  { %128 = vst [vmem:[#allocation8] sm:$0xff] %v126_v7 }
  0xa1   :  { %v110_v8 = vpop.f32.mrf.mxu0 }
  0xa2   :  { %v127_v9 = vadd.f32 %v183_v5, %v110_v8 }
  0xa4   :  { %129 = vst [vmem:[#allocation8 + $0x8] sm:$0xff] %v127_v9 }
  0xa5   :  { %142 = dma.vmem_to_hbm [thread:$0]  %s135_s25, 256, %s137_s28, [#allocation5], %s267_s29, %s267_s29, %s268_s30  }
  0xa6   :  { %260 = dma.done.wait [#allocation5], 256  }
  0xa7   :  { %261 = vsyncadd [#allocation5], 4294967040 }
  0xa8   :  { %147 = vsyncpa [#allocation4], 1 }
  0xa9   :  { %148 = vsyncpa [#allocation7], 1 }
  0xaa   :  { %149 = vsyncpa [#allocation5], 1 }

</bundles_post_ra>
